<compile_context>
chip_gen: v5e
topology: v5e:2x2
jax: 0.10.0
libtpu: 0.0.40
codegen_flags: <defaults>
</compile_context>

<pallas_src>
import functools

import jax
import jax.numpy as jnp
from jax.experimental import pallas as pl
from jax.experimental.pallas import tpu as pltpu

NUM_PARAMS = 3
_BOUND_EPS = 0.001
_CDF_LOWER_BOUND = 1e-12
_LOG_SCALES_MIN = -7.0


def _logistic_log_prob(x, mu, log_scales_raw, *, half_bin, x_lower, x_upper):
    """Discretized-logistic log-probability for one mixture component.

    Shared (identical arithmetic) by the Pallas kernel and the pure-JAX
    reference.  Branches are fused so a single log covers:
        x < lower : log(sigmoid(plus_in))    = min(plus_in, 0) + log(r_plus)
        x > upper : log(1 - sigmoid(min_in)) = -max(min_in, 0) + log(r_min)
        otherwise : log(clamp(cdf_plus - cdf_min, 1e-12))
    where r_z = sigmoid(|z|) = 1/(1 + exp(-|z|)) is reused from the sigmoid.
    """
    ls = jnp.maximum(log_scales_raw, _LOG_SCALES_MIN)
    inv_sigma = jnp.exp(-ls)
    centered = x - mu
    plus_in = inv_sigma * (centered + half_bin)
    min_in = inv_sigma * (centered - half_bin)

    e_plus = jnp.exp(-jnp.abs(plus_in))
    e_min = jnp.exp(-jnp.abs(min_in))
    r_plus = 1.0 / (1.0 + e_plus)          # sigmoid(|plus_in|)
    r_min = 1.0 / (1.0 + e_min)            # sigmoid(|min_in|)
    cdf_plus = jnp.where(plus_in >= 0.0, r_plus, e_plus * r_plus)
    cdf_min = jnp.where(min_in >= 0.0, r_min, e_min * r_min)
    cdf_delta = jnp.maximum(cdf_plus - cdf_min, _CDF_LOWER_BOUND)

    is_lo = x < x_lower
    is_hi = x > x_upper
    lin = jnp.where(is_lo, jnp.minimum(plus_in, 0.0),
                    jnp.where(is_hi, -jnp.maximum(min_in, 0.0), 0.0))
    log_arg = jnp.where(is_lo, r_plus, jnp.where(is_hi, r_min, cdf_delta))
    return lin + jnp.log(log_arg)


def _dlmm_kernel(x_ref, w_ref, mu_ref, ls_ref, out_ref, w_acc, lpw_acc, *,
                 K, half_bin, x_lower, x_upper):
    k = pl.program_id(3)

    x = x_ref[...].astype(jnp.float32)                    # (tc, tm)
    w_k = w_ref[...].astype(jnp.float32)                  # raw mixture logit k
    mu_k = mu_ref[...].astype(jnp.float32)
    ls_k = ls_ref[...].astype(jnp.float32)

    log_prob = _logistic_log_prob(x, mu_k, ls_k, half_bin=half_bin,
                                  x_lower=x_lower, x_upper=x_upper)

    # Stash this mixture component's slabs; K is the innermost grid axis so the
    # scratch buffers hold all K slabs of the current (b, c-chunk, m-chunk).
    w_acc[k] = w_k
    lpw_acc[k] = log_prob + w_k

    @pl.when(k == K - 1)
    def _finalize():
        def lse_over_k(acc):
            m = acc[0]
            for kk in range(1, K):
                m = jnp.maximum(m, acc[kk])
            s = jnp.exp(acc[0] - m)
            for kk in range(1, K):
                s = s + jnp.exp(acc[kk] - m)
            return m + jnp.log(s)

        # -logsumexp_k(log_prob_k + log_softmax_k(w)) == lse_k(w) - lse_k(lp+w)
        out = lse_over_k(w_acc) - lse_over_k(lpw_acc)
        out_ref[...] = out.astype(out_ref.dtype)


def _pick_tiles(C, M, K):
    """Choose (tc, tm): tc multiple of 8 (or full C), tm multiple of 128."""
    if M <= 2048:
        tm = M
    else:
        tm = 128
        d = 256
        while d <= 2048:
            if M % d == 0:
                tm = d
            d += 128
    # Target elements per (tc, tm) slab, bounded so double-buffered I/O blocks
    # (~10 slabs) plus the (2, K, tc, tm) f32 scratch stay under ~36 MiB.
    target = max(8 * 128, min(128 * 1024, (36 << 20) // (4 * (10 + 2 * K))))
    target_rows = max(8, target // tm)
    if C % 8 == 0:
        tc = min(C, max(8, (target_rows // 8) * 8))
        while C % tc:
            tc -= 8
    else:
        tc = C   # full-C block (sublane padding only occurs when C < 8)
    return tc, tm


def dlmm_forward(x, params, *, x_min, x_max, L, K):
    """x: (B, C, H, W); params: (B, 3*C*K, H, W). Returns (B, C, H, W)."""
    B, C, H, W = x.shape
    assert params.shape == (B, NUM_PARAMS * C * K, H, W), params.shape
    M = H * W
    # TODO(synk): support H*W that is not a multiple of 128 (needs masked tail).
    assert M % 128 == 0, "H*W must be a multiple of 128"
    # TODO(synk): the PyTorch runtime range-check assert(x.min()>=x_min, ...) is
    # not reproduced in-kernel.

    bin_width = (x_max - x_min) / (L - 1)
    half_bin = bin_width / 2.0
    x_lower = x_min + _BOUND_EPS
    x_upper = x_max - _BOUND_EPS

    # Free views of the original buffers -- no copies, no dtype casts in XLA.
    x_v = x.reshape(B, C, M)
    p_v = params.reshape(B, NUM_PARAMS, C, K * M)

    tc, tm = _pick_tiles(C, M, K)
    mt = M // tm
    grid = (B, C // tc, mt, K)           # K last => reduction axis innermost

    x_spec = pl.BlockSpec((None, tc, tm), lambda b, ci, mi, k: (b, ci, mi))
    out_spec = pl.BlockSpec((None, tc, tm), lambda b, ci, mi, k: (b, ci, mi))

    def pspec(g):
        # Select parameter group g and mixture k from the single contiguous
        # params buffer: lane-block index = k * (M // tm) + mi.
        return pl.BlockSpec((None, None, tc, tm),
                            lambda b, ci, mi, k: (b, g, ci, k * mt + mi))

    kernel = functools.partial(_dlmm_kernel, K=K, half_bin=half_bin,
                               x_lower=x_lower, x_upper=x_upper)

    out = pl.pallas_call(
        kernel,
        out_shape=jax.ShapeDtypeStruct((B, C, M), x.dtype),
        grid_spec=pltpu.PrefetchScalarGridSpec(
            num_scalar_prefetch=0,
            grid=grid,
            in_specs=[x_spec, pspec(0), pspec(1), pspec(2)],
            out_specs=out_spec,
            scratch_shapes=[pltpu.VMEM((K, tc, tm), jnp.float32),
                            pltpu.VMEM((K, tc, tm), jnp.float32)]),
        compiler_params=pltpu.CompilerParams(
            dimension_semantics=("parallel", "parallel", "parallel", "arbitrary"),
            vmem_limit_bytes=48 * 1024 * 1024),
    )(x_v, p_v, p_v, p_v)

    return out.reshape(B, C, H, W)


def _reference(x, params, *, x_min, x_max, L, K):
    """Pure-JAX reference mirroring the PyTorch forward."""
    B, C, H, W = x.shape
    bin_width = (x_max - x_min) / (L - 1)
    p = params.reshape(B, NUM_PARAMS, C, K, H, W).astype(jnp.float32)
    w = p[:, 0]                               # raw mixture logits (B,C,K,H,W)
    means = p[:, 1]
    log_scales = p[:, 2]
    xe = x.astype(jnp.float32)[:, :, None, :, :]
    log_probs = _logistic_log_prob(
        xe, means, log_scales, half_bin=bin_width / 2.0,
        x_lower=x_min + _BOUND_EPS, x_upper=x_max - _BOUND_EPS)
    # -lse_k(log_probs + log_softmax_k(w)) == lse_k(w) - lse_k(log_probs + w)
    lse = jax.scipy.special.logsumexp
    return (lse(w, axis=2) - lse(log_probs + w, axis=2)).astype(x.dtype)


if __name__ == "__main__":
    # small deterministic example: B=2, C=8 channels, 16x16 spatial, K=4, L=256
    B, C, H, W = 2, 8, 16, 16
    K, L = 4, 256
    x_min, x_max = -1.0, 1.0

    key = jax.random.PRNGKey(0)
    kx, kp = jax.random.split(key)
    x = jax.random.uniform(kx, (B, C, H, W), jnp.float32,
                           minval=x_min, maxval=x_max)
    params = jax.random.normal(kp, (B, NUM_PARAMS * C * K, H, W), jnp.float32)

    fwd = jax.jit(functools.partial(dlmm_forward, x_min=x_min, x_max=x_max,
                                    L=L, K=K))
    out = jax.block_until_ready(fwd(x, params))

    ref = _reference(x, params, x_min=x_min, x_max=x_max, L=L, K=K)
    assert out.shape == (B, C, H, W)
    # f32 + log-sum-exp re-association between kernel and reference -> 5e-4 band.
    assert jnp.allclose(out, ref, atol=5e-4, rtol=5e-4), \
        f"max abs diff {jnp.max(jnp.abs(out - ref))}"
    print("KERNEL_OK")
</pallas_src>

<mosaic_0001>
module attributes {stable_mosaic.version = 11 : i64} {
  func.func @_dlmm_kernel(%arg0: i32, %arg1: i32, %arg2: i32, %arg3: i32, %arg4: memref<1x8x256xf32, #tpu.memory_space<vmem>>, %arg5: memref<1x1x8x256xf32, #tpu.memory_space<vmem>>, %arg6: memref<1x1x8x256xf32, #tpu.memory_space<vmem>>, %arg7: memref<1x1x8x256xf32, #tpu.memory_space<vmem>>, %arg8: memref<1x8x256xf32, #tpu.memory_space<vmem>>, %arg9: memref<4x8x256xf32, #tpu.memory_space<vmem>>, %arg10: memref<4x8x256xf32, #tpu.memory_space<vmem>>) attributes {dimension_semantics = [#tpu.dimension_semantics<parallel>, #tpu.dimension_semantics<parallel>, #tpu.dimension_semantics<parallel>, #tpu.dimension_semantics<arbitrary>], iteration_bounds = array<i64: 2, 1, 1, 4>, scalar_prefetch = 0 : i64, scratch_operands = 2 : i64, tpu.core_type = #tpu.core_type<tc>, window_params = [{transform_indices = @transform_0, window_bounds = array<i64: 1, 8, 256>}, {transform_indices = @transform_1, window_bounds = array<i64: 1, 1, 8, 256>}, {transform_indices = @transform_2, window_bounds = array<i64: 1, 1, 8, 256>}, {transform_indices = @transform_3, window_bounds = array<i64: 1, 1, 8, 256>}, {transform_indices = @transform_4, window_bounds = array<i64: 1, 8, 256>}]} {
    %c0 = arith.constant 0 : index
    %c0_0 = arith.constant 0 : index
    %c0_1 = arith.constant 0 : index
    %0 = vector.load %arg4[%c0, %c0_0, %c0_1] : memref<1x8x256xf32, #tpu.memory_space<vmem>>, vector<1x8x256xf32>
    %1 = vector.shape_cast %0 : vector<1x8x256xf32> to vector<8x256xf32>
    %c0_2 = arith.constant 0 : index
    %c0_3 = arith.constant 0 : index
    %c0_4 = arith.constant 0 : index
    %c0_5 = arith.constant 0 : index
    %2 = vector.load %arg5[%c0_2, %c0_3, %c0_4, %c0_5] : memref<1x1x8x256xf32, #tpu.memory_space<vmem>>, vector<1x1x8x256xf32>
    %3 = vector.shape_cast %2 : vector<1x1x8x256xf32> to vector<8x256xf32>
    %c0_6 = arith.constant 0 : index
    %c0_7 = arith.constant 0 : index
    %c0_8 = arith.constant 0 : index
    %c0_9 = arith.constant 0 : index
    %4 = vector.load %arg6[%c0_6, %c0_7, %c0_8, %c0_9] : memref<1x1x8x256xf32, #tpu.memory_space<vmem>>, vector<1x1x8x256xf32>
    %5 = vector.shape_cast %4 : vector<1x1x8x256xf32> to vector<8x256xf32>
    %c0_10 = arith.constant 0 : index
    %c0_11 = arith.constant 0 : index
    %c0_12 = arith.constant 0 : index
    %c0_13 = arith.constant 0 : index
    %6 = vector.load %arg7[%c0_10, %c0_11, %c0_12, %c0_13] : memref<1x1x8x256xf32, #tpu.memory_space<vmem>>, vector<1x1x8x256xf32>
    %7 = vector.shape_cast %6 : vector<1x1x8x256xf32> to vector<8x256xf32>
    %cst = arith.constant -7.000000e+00 : f32
    %8 = vector.broadcast %cst : f32 to vector<8x256xf32>
    %9 = arith.maximumf %7, %8 : vector<8x256xf32>
    %cst_14 = arith.constant 0.000000e+00 : f32
    %10 = vector.broadcast %cst_14 : f32 to vector<8x256xf32>
    %11 = arith.subf %10, %9 : vector<8x256xf32>
    %12 = math.exp %11 : vector<8x256xf32>
    %13 = arith.subf %1, %5 : vector<8x256xf32>
    %cst_15 = arith.constant 0.00392156886 : f32
    %14 = vector.broadcast %cst_15 : f32 to vector<8x256xf32>
    %15 = arith.addf %13, %14 : vector<8x256xf32>
    %16 = arith.mulf %12, %15 : vector<8x256xf32>
    %cst_16 = arith.constant 0.00392156886 : f32
    %17 = vector.broadcast %cst_16 : f32 to vector<8x256xf32>
    %18 = arith.subf %13, %17 : vector<8x256xf32>
    %19 = arith.mulf %12, %18 : vector<8x256xf32>
    %20 = math.absf %16 : vector<8x256xf32>
    %cst_17 = arith.constant 0.000000e+00 : f32
    %21 = vector.broadcast %cst_17 : f32 to vector<8x256xf32>
    %22 = arith.subf %21, %20 : vector<8x256xf32>
    %23 = math.exp %22 : vector<8x256xf32>
    %24 = math.absf %19 : vector<8x256xf32>
    %cst_18 = arith.constant 0.000000e+00 : f32
    %25 = vector.broadcast %cst_18 : f32 to vector<8x256xf32>
    %26 = arith.subf %25, %24 : vector<8x256xf32>
    %27 = math.exp %26 : vector<8x256xf32>
    %cst_19 = arith.constant 1.000000e+00 : f32
    %28 = vector.broadcast %cst_19 : f32 to vector<8x256xf32>
    %29 = arith.addf %28, %23 : vector<8x256xf32>
    %cst_20 = arith.constant 1.000000e+00 : f32
    %30 = vector.broadcast %cst_20 : f32 to vector<8x256xf32>
    %31 = arith.divf %30, %29 : vector<8x256xf32>
    %cst_21 = arith.constant 1.000000e+00 : f32
    %32 = vector.broadcast %cst_21 : f32 to vector<8x256xf32>
    %33 = arith.addf %32, %27 : vector<8x256xf32>
    %cst_22 = arith.constant 1.000000e+00 : f32
    %34 = vector.broadcast %cst_22 : f32 to vector<8x256xf32>
    %35 = arith.divf %34, %33 : vector<8x256xf32>
    %cst_23 = arith.constant 0.000000e+00 : f32
    %36 = vector.broadcast %cst_23 : f32 to vector<8x256xf32>
    %37 = arith.cmpf oge, %16, %36 : vector<8x256xf32>
    %38 = arith.mulf %23, %31 : vector<8x256xf32>
    %39 = arith.select %37, %31, %38 : vector<8x256xi1>, vector<8x256xf32>
    %cst_24 = arith.constant 0.000000e+00 : f32
    %40 = vector.broadcast %cst_24 : f32 to vector<8x256xf32>
    %41 = arith.cmpf oge, %19, %40 : vector<8x256xf32>
    %42 = arith.mulf %27, %35 : vector<8x256xf32>
    %43 = arith.select %41, %35, %42 : vector<8x256xi1>, vector<8x256xf32>
    %44 = arith.subf %39, %43 : vector<8x256xf32>
    %cst_25 = arith.constant 9.99999996E-13 : f32
    %45 = vector.broadcast %cst_25 : f32 to vector<8x256xf32>
    %46 = arith.maximumf %44, %45 : vector<8x256xf32>
    %cst_26 = arith.constant -9.990000e-01 : f32
    %47 = vector.broadcast %cst_26 : f32 to vector<8x256xf32>
    %48 = arith.cmpf olt, %1, %47 : vector<8x256xf32>
    %cst_27 = arith.constant 9.990000e-01 : f32
    %49 = vector.broadcast %cst_27 : f32 to vector<8x256xf32>
    %50 = arith.cmpf ogt, %1, %49 : vector<8x256xf32>
    %cst_28 = arith.constant 0.000000e+00 : f32
    %51 = vector.broadcast %cst_28 : f32 to vector<8x256xf32>
    %52 = arith.minimumf %16, %51 : vector<8x256xf32>
    %cst_29 = arith.constant 0.000000e+00 : f32
    %53 = vector.broadcast %cst_29 : f32 to vector<8x256xf32>
    %54 = arith.maximumf %19, %53 : vector<8x256xf32>
    %cst_30 = arith.constant 0.000000e+00 : f32
    %55 = vector.broadcast %cst_30 : f32 to vector<8x256xf32>
    %56 = arith.subf %55, %54 : vector<8x256xf32>
    %cst_31 = arith.constant 0.000000e+00 : f32
    %57 = vector.broadcast %cst_31 : f32 to vector<8x256xf32>
    %58 = arith.select %50, %56, %57 : vector<8x256xi1>, vector<8x256xf32>
    %59 = arith.select %48, %52, %58 : vector<8x256xi1>, vector<8x256xf32>
    %60 = arith.select %50, %35, %46 : vector<8x256xi1>, vector<8x256xf32>
    %61 = arith.select %48, %31, %60 : vector<8x256xi1>, vector<8x256xf32>
    %62 = math.log %61 : vector<8x256xf32>
    %63 = arith.addf %59, %62 : vector<8x256xf32>
    %64 = arith.index_cast %arg3 : i32 to index
    %c0_32 = arith.constant 0 : index
    %c0_33 = arith.constant 0 : index
    %65 = vector.load %arg9[%64, %c0_32, %c0_33] : memref<4x8x256xf32, #tpu.memory_space<vmem>>, vector<1x8x256xf32>
    %66 = vector.shape_cast %65 : vector<1x8x256xf32> to vector<8x256xf32>
    %67 = vector.shape_cast %3 : vector<8x256xf32> to vector<1x8x256xf32>
    tpu.vector_store %arg9[%64, %c0_32, %c0_33], %67 {strides = array<i32>} : memref<4x8x256xf32, #tpu.memory_space<vmem>>, vector<1x8x256xf32>,
    %68 = arith.addf %63, %3 : vector<8x256xf32>
    %69 = arith.index_cast %arg3 : i32 to index
    %c0_34 = arith.constant 0 : index
    %c0_35 = arith.constant 0 : index
    %70 = vector.load %arg10[%69, %c0_34, %c0_35] : memref<4x8x256xf32, #tpu.memory_space<vmem>>, vector<1x8x256xf32>
    %71 = vector.shape_cast %70 : vector<1x8x256xf32> to vector<8x256xf32>
    %72 = vector.shape_cast %68 : vector<8x256xf32> to vector<1x8x256xf32>
    tpu.vector_store %arg10[%69, %c0_34, %c0_35], %72 {strides = array<i32>} : memref<4x8x256xf32, #tpu.memory_space<vmem>>, vector<1x8x256xf32>,
    %c3_i32 = arith.constant 3 : i32
    %73 = arith.cmpi eq, %arg3, %c3_i32 : i32
    %74 = arith.extui %73 : i1 to i32
    %c0_i32 = arith.constant 0 : i32
    %75 = arith.cmpi ne, %74, %c0_i32 : i32
    scf.if %75 {
      %c0_36 = arith.constant 0 : index
      %c0_37 = arith.constant 0 : index
      %c0_38 = arith.constant 0 : index
      %76 = vector.load %arg9[%c0_36, %c0_37, %c0_38] : memref<4x8x256xf32, #tpu.memory_space<vmem>>, vector<1x8x256xf32>
      %77 = vector.shape_cast %76 : vector<1x8x256xf32> to vector<8x256xf32>
      %c1 = arith.constant 1 : index
      %c0_39 = arith.constant 0 : index
      %c0_40 = arith.constant 0 : index
      %78 = vector.load %arg9[%c1, %c0_39, %c0_40] : memref<4x8x256xf32, #tpu.memory_space<vmem>>, vector<1x8x256xf32>
      %79 = vector.shape_cast %78 : vector<1x8x256xf32> to vector<8x256xf32>
      %80 = arith.maximumf %77, %79 : vector<8x256xf32>
      %c2 = arith.constant 2 : index
      %c0_41 = arith.constant 0 : index
      %c0_42 = arith.constant 0 : index
      %81 = vector.load %arg9[%c2, %c0_41, %c0_42] : memref<4x8x256xf32, #tpu.memory_space<vmem>>, vector<1x8x256xf32>
      %82 = vector.shape_cast %81 : vector<1x8x256xf32> to vector<8x256xf32>
      %83 = arith.maximumf %80, %82 : vector<8x256xf32>
      %c3 = arith.constant 3 : index
      %c0_43 = arith.constant 0 : index
      %c0_44 = arith.constant 0 : index
      %84 = vector.load %arg9[%c3, %c0_43, %c0_44] : memref<4x8x256xf32, #tpu.memory_space<vmem>>, vector<1x8x256xf32>
      %85 = vector.shape_cast %84 : vector<1x8x256xf32> to vector<8x256xf32>
      %86 = arith.maximumf %83, %85 : vector<8x256xf32>
      %c0_45 = arith.constant 0 : index
      %c0_46 = arith.constant 0 : index
      %c0_47 = arith.constant 0 : index
      %87 = vector.load %arg9[%c0_45, %c0_46, %c0_47] : memref<4x8x256xf32, #tpu.memory_space<vmem>>, vector<1x8x256xf32>
      %88 = vector.shape_cast %87 : vector<1x8x256xf32> to vector<8x256xf32>
      %89 = arith.subf %88, %86 : vector<8x256xf32>
      %90 = math.exp %89 : vector<8x256xf32>
      %c1_48 = arith.constant 1 : index
      %c0_49 = arith.constant 0 : index
      %c0_50 = arith.constant 0 : index
      %91 = vector.load %arg9[%c1_48, %c0_49, %c0_50] : memref<4x8x256xf32, #tpu.memory_space<vmem>>, vector<1x8x256xf32>
      %92 = vector.shape_cast %91 : vector<1x8x256xf32> to vector<8x256xf32>
      %93 = arith.subf %92, %86 : vector<8x256xf32>
      %94 = math.exp %93 : vector<8x256xf32>
      %95 = arith.addf %90, %94 : vector<8x256xf32>
      %c2_51 = arith.constant 2 : index
      %c0_52 = arith.constant 0 : index
      %c0_53 = arith.constant 0 : index
      %96 = vector.load %arg9[%c2_51, %c0_52, %c0_53] : memref<4x8x256xf32, #tpu.memory_space<vmem>>, vector<1x8x256xf32>
      %97 = vector.shape_cast %96 : vector<1x8x256xf32> to vector<8x256xf32>
      %98 = arith.subf %97, %86 : vector<8x256xf32>
      %99 = math.exp %98 : vector<8x256xf32>
      %100 = arith.addf %95, %99 : vector<8x256xf32>
      %c3_54 = arith.constant 3 : index
      %c0_55 = arith.constant 0 : index
      %c0_56 = arith.constant 0 : index
      %101 = vector.load %arg9[%c3_54, %c0_55, %c0_56] : memref<4x8x256xf32, #tpu.memory_space<vmem>>, vector<1x8x256xf32>
      %102 = vector.shape_cast %101 : vector<1x8x256xf32> to vector<8x256xf32>
      %103 = arith.subf %102, %86 : vector<8x256xf32>
      %104 = math.exp %103 : vector<8x256xf32>
      %105 = arith.addf %100, %104 : vector<8x256xf32>
      %106 = math.log %105 : vector<8x256xf32>
      %107 = arith.addf %86, %106 : vector<8x256xf32>
      %c0_57 = arith.constant 0 : index
      %c0_58 = arith.constant 0 : index
      %c0_59 = arith.constant 0 : index
      %108 = vector.load %arg10[%c0_57, %c0_58, %c0_59] : memref<4x8x256xf32, #tpu.memory_space<vmem>>, vector<1x8x256xf32>
      %109 = vector.shape_cast %108 : vector<1x8x256xf32> to vector<8x256xf32>
      %c1_60 = arith.constant 1 : index
      %c0_61 = arith.constant 0 : index
      %c0_62 = arith.constant 0 : index
      %110 = vector.load %arg10[%c1_60, %c0_61, %c0_62] : memref<4x8x256xf32, #tpu.memory_space<vmem>>, vector<1x8x256xf32>
      %111 = vector.shape_cast %110 : vector<1x8x256xf32> to vector<8x256xf32>
      %112 = arith.maximumf %109, %111 : vector<8x256xf32>
      %c2_63 = arith.constant 2 : index
      %c0_64 = arith.constant 0 : index
      %c0_65 = arith.constant 0 : index
      %113 = vector.load %arg10[%c2_63, %c0_64, %c0_65] : memref<4x8x256xf32, #tpu.memory_space<vmem>>, vector<1x8x256xf32>
      %114 = vector.shape_cast %113 : vector<1x8x256xf32> to vector<8x256xf32>
      %115 = arith.maximumf %112, %114 : vector<8x256xf32>
      %c3_66 = arith.constant 3 : index
      %c0_67 = arith.constant 0 : index
      %c0_68 = arith.constant 0 : index
      %116 = vector.load %arg10[%c3_66, %c0_67, %c0_68] : memref<4x8x256xf32, #tpu.memory_space<vmem>>, vector<1x8x256xf32>
      %117 = vector.shape_cast %116 : vector<1x8x256xf32> to vector<8x256xf32>
      %118 = arith.maximumf %115, %117 : vector<8x256xf32>
      %c0_69 = arith.constant 0 : index
      %c0_70 = arith.constant 0 : index
      %c0_71 = arith.constant 0 : index
      %119 = vector.load %arg10[%c0_69, %c0_70, %c0_71] : memref<4x8x256xf32, #tpu.memory_space<vmem>>, vector<1x8x256xf32>
      %120 = vector.shape_cast %119 : vector<1x8x256xf32> to vector<8x256xf32>
      %121 = arith.subf %120, %118 : vector<8x256xf32>
      %122 = math.exp %121 : vector<8x256xf32>
      %c1_72 = arith.constant 1 : index
      %c0_73 = arith.constant 0 : index
      %c0_74 = arith.constant 0 : index
      %123 = vector.load %arg10[%c1_72, %c0_73, %c0_74] : memref<4x8x256xf32, #tpu.memory_space<vmem>>, vector<1x8x256xf32>
      %124 = vector.shape_cast %123 : vector<1x8x256xf32> to vector<8x256xf32>
      %125 = arith.subf %124, %118 : vector<8x256xf32>
      %126 = math.exp %125 : vector<8x256xf32>
      %127 = arith.addf %122, %126 : vector<8x256xf32>
      %c2_75 = arith.constant 2 : index
      %c0_76 = arith.constant 0 : index
      %c0_77 = arith.constant 0 : index
      %128 = vector.load %arg10[%c2_75, %c0_76, %c0_77] : memref<4x8x256xf32, #tpu.memory_space<vmem>>, vector<1x8x256xf32>
      %129 = vector.shape_cast %128 : vector<1x8x256xf32> to vector<8x256xf32>
      %130 = arith.subf %129, %118 : vector<8x256xf32>
      %131 = math.exp %130 : vector<8x256xf32>
      %132 = arith.addf %127, %131 : vector<8x256xf32>
      %c3_78 = arith.constant 3 : index
      %c0_79 = arith.constant 0 : index
      %c0_80 = arith.constant 0 : index
      %133 = vector.load %arg10[%c3_78, %c0_79, %c0_80] : memref<4x8x256xf32, #tpu.memory_space<vmem>>, vector<1x8x256xf32>
      %134 = vector.shape_cast %133 : vector<1x8x256xf32> to vector<8x256xf32>
      %135 = arith.subf %134, %118 : vector<8x256xf32>
      %136 = math.exp %135 : vector<8x256xf32>
      %137 = arith.addf %132, %136 : vector<8x256xf32>
      %138 = math.log %137 : vector<8x256xf32>
      %139 = arith.addf %118, %138 : vector<8x256xf32>
      %140 = arith.subf %107, %139 : vector<8x256xf32>
      %c0_81 = arith.constant 0 : index
      %c0_82 = arith.constant 0 : index
      %c0_83 = arith.constant 0 : index
      %141 = vector.load %arg8[%c0_81, %c0_82, %c0_83] : memref<1x8x256xf32, #tpu.memory_space<vmem>>, vector<1x8x256xf32>
      %142 = vector.shape_cast %141 : vector<1x8x256xf32> to vector<8x256xf32>
      %143 = vector.shape_cast %140 : vector<8x256xf32> to vector<1x8x256xf32>
      tpu.vector_store %arg8[%c0_81, %c0_82, %c0_83], %143 {strides = array<i32>} : memref<1x8x256xf32, #tpu.memory_space<vmem>>, vector<1x8x256xf32>,
    } else {
    }
    return
  }
  func.func @transform_0(%arg0: i32, %arg1: i32, %arg2: i32, %arg3: i32) -> (i32, i32, i32) {
    %c0_i32 = arith.constant 0 : i32
    return %arg0, %arg1, %arg2 : i32, i32, i32
  }
  func.func @transform_1(%arg0: i32, %arg1: i32, %arg2: i32, %arg3: i32) -> (i32, i32, i32, i32) {
    %c1_i32 = arith.constant 1 : i32
    %0 = arith.muli %arg3, %c1_i32 : i32
    %1 = arith.addi %0, %arg2 : i32
    %c0_i32 = arith.constant 0 : i32
    %c0_i32_0 = arith.constant 0 : i32
    return %arg0, %c0_i32, %arg1, %1 : i32, i32, i32, i32
  }
  func.func @transform_2(%arg0: i32, %arg1: i32, %arg2: i32, %arg3: i32) -> (i32, i32, i32, i32) {
    %c1_i32 = arith.constant 1 : i32
    %0 = arith.muli %arg3, %c1_i32 : i32
    %1 = arith.addi %0, %arg2 : i32
    %c1_i32_0 = arith.constant 1 : i32
    %c0_i32 = arith.constant 0 : i32
    return %arg0, %c1_i32_0, %arg1, %1 : i32, i32, i32, i32
  }
  func.func @transform_3(%arg0: i32, %arg1: i32, %arg2: i32, %arg3: i32) -> (i32, i32, i32, i32) {
    %c1_i32 = arith.constant 1 : i32
    %0 = arith.muli %arg3, %c1_i32 : i32
    %1 = arith.addi %0, %arg2 : i32
    %c2_i32 = arith.constant 2 : i32
    %c0_i32 = arith.constant 0 : i32
    return %arg0, %c2_i32, %arg1, %1 : i32, i32, i32, i32
  }
  func.func @transform_4(%arg0: i32, %arg1: i32, %arg2: i32, %arg3: i32) -> (i32, i32, i32) {
    %c0_i32 = arith.constant 0 : i32
    return %arg0, %arg1, %arg2 : i32, i32, i32
  }
}

</mosaic_0001>

<bundles_post_ra>
// kernel: dlmm_forward.1
= control target key start
LH: loop header
LB: loop body
LE: loop exit
PB: predicated region body
PF: predicated region fallthrough
CT: control target
= control target key end

     0   :  { %s1124_s15 = smov 0   ;;  %s1126_s16 = smov 0   ;;  %s1323_s0 = inlined_call_operand.vmem [shape: f32[2,8,256], index: 0, kind: input, shape index: {}]   ;;  %s1324_s1 = inlined_call_operand.vmem [shape: f32[2,3,8,1024], index: 1, kind: input, shape index: {}, may-alias: {1,2,3}]   ;;  %s1325_s2 = inlined_call_operand.vmem [shape: f32[2,3,8,1024], index: 2, kind: input, shape index: {}, may-alias: {1,2,3}]   ;;  %s1326_s3 = inlined_call_operand.vmem [shape: f32[2,3,8,1024], index: 3, kind: input, shape index: {}, may-alias: {1,2,3}]   ;;  %s1327_s4 = inlined_call_operand.vmem [shape: f32[2,8,256], index: 4, kind: output, shape index: {}]  }
   0x1   :  { %s1128_s17 = smov 0   ;;  %s1130_s18 = smov 0  }
   0x2   :  { %s1132_s19 = smov 0  }
   0x3 LB: > { %s29_s20 = sadd.s32 1, %s1089_s17  ;;  %s40_s21 = sadd.s32 1, %s1093_s18  ;;  %s1097_s19 = sphi %s1132_s19, %s14_s19   ;;  %s1093_s18 = sphi %s1130_s18, %s1339_s18   ;;  %s1089_s17 = sphi %s1128_s17, %s1338_s17   ;;  %s1085_s16 = sphi %s1126_s16, %s1337_s16   ;;  %s1081_s15 = sphi %s1124_s15, %s1336_s15  }
   0x4   : > { %p30_p0 = scmp.ge.s32.totalorder %s29_s20, 4  ;;  %p927_p1 = scmp.ge.s32.totalorder %s1097_s19, 1 }
   0x5   : > { %p288_p2 = scmp.lt.s32.totalorder %s1097_s19, 9 }
   0x6   : > { %s1341_s20 = smov (%p30_p0, %s29_s20), 0  ;;  %s1343_s21 = smov (!%p30_p0, %s40_s21), %s1093_s18 }
   0x7   : > { %p289_p3 = pnand %p927_p1, %p288_p2  ;;  %p42_p4 = scmp.ge.s32.totalorder %s1343_s21, 2 }
   0x8   : > { %p375_p5 = scmp.lt.s32.totalorder (!%p289_p3), %s1085_s16, 1  ;;  %s930_s22 = sshll.u32 (!%p289_p3), %s1081_s15, 1 }
   0x9   : > { %s1345_s21 = smov (%p42_p4, %s1343_s21), 0  ;;  %292 = sbr.rel (%p289_p3) target bundleno = 148 (0x94), region = 36 }
   0xa   : > { %p394_p6 = scmp.lt.s32.totalorder (!%p289_p3), %s930_s22, 7  ;;  %s952_s23 = sshll.u32 (!%p289_p3), %s1081_s15, 4 }
   0xb   : > { %p947_p7 = scmp.ne.s32.totalorder (!%p289_p3), %s1081_s15, 3 }
   0xe   : > { %s1347_s16 = smov (!%p375_p5, %s1085_s16), 1  ;;  %s1349_s22 = smov (!%p394_p6, %s930_s22), 7 }
   0xf   : > { %s950_s24 = sshll.u32 %s1347_s16, 4  ;;  %s954_s25 = smul.u32 24, %s1347_s16 }
  0x10   : > { %s1161_s28 = scalar_lea.vmem %s1327_s4, %s950_s24  ;;  %s386_s13 = scalar_lea.vmem %s1323_s0, %s950_s24 }
  0x11   : > { %s399_s29 = sadd.s32 %s954_s25, %s1349_s22  ;;  %s600_s22 = scalar_lea.vmem [#allocation2], %s952_s23  ;;  %v1180_v5 = vld [vmem:[%s386_s13] sm:$0xff]  ;;  %v1184_v10 = vld [vmem:[%s386_s13 + $0x8] sm:$0xff] }
  0x12   : > { %s931_s30 = sshll.u32 %s399_s29, 3  ;;  %s606_s24 = scalar_lea.vmem [#allocation3], %s952_s23 }
  0x13   : > { %s401_s7 = scalar_lea.vmem %s1324_s1, %s931_s30  ;;  %s843_s10 = scalar_lea.vmem %s1326_s3, %s931_s30 }
  0x14   : > { %v1169_v0 = vld [vmem:[%s401_s7] sm:$0xff]  ;;  %s836_s26 = scalar_lea.vmem %s1325_s2, %s931_s30  ;;  %v941_v2 = vld [vmem:[%s843_s10 + $0x88] sm:$0xff] }
  0x15   : > { %v940_v1 = vld [vmem:[%s843_s10 + $0x80] sm:$0xff]  ;;  %601 = vst [vmem:[%s600_s22] sm:$0xff] %v1169_v0  ;;  %v461_v4 = vmax.f32 %v941_v2, -7.0  ;;  %v1182_v9 = vld [vmem:[%s401_s7 + $0x8] sm:$0xff] }
  0x16   : > { %v460_v3 = vmax.f32 %v940_v1, -7.0  ;;  %v938_v6 = vld [vmem:[%s836_s26 + $0x40] sm:$0xff]  ;;  %v939_v11 = vld [vmem:[%s836_s26 + $0x48] sm:$0xff]  ;;  %602 = vst [vmem:[%s600_s22 + $0x8] sm:$0xff] %v1182_v9 }
  0x17   : > { %v463_v8 = vsub.f32 0.0, %v461_v4  ;;  %v468_v14 = vsub.f32 %v1180_v5, %v938_v6  ;;  %v469_v15 = vsub.f32 %v1184_v10, %v939_v11 }
  0x18   : > { %v462_v7 = vsub.f32 0.0, %v460_v3 }
  0x19   : > { %v466_v13 = vmul.f32 1.442695, %v463_v8  ;;  %v470_v16 = vadd.f32 0.003921569, %v468_v14  ;;  %v942_v17 = vadd.f32 -0.003921569, %v468_v14 }
  0x1a   : > { %v464_v12 = vmul.f32 1.442695, %v462_v7  ;;  %v471_v18 = vadd.f32 0.003921569, %v469_v15  ;;  %v943_v19 = vadd.f32 -0.003921569, %v469_v15 }
  0x1c   : > { %995 = vpow2.f32 %v464_v12 }
  0x1d   : > { %997 = vpow2.f32 %v466_v13 }
  0x22   : > { %v996_v20 = vpop.eup %995 }
  0x23   : > { %v998_v21 = vpop.eup %997  ;;  %v1189_v22 = vmul.f32 %v996_v20, %v470_v16  ;;  %v1191_v23 = vmul.f32 %v996_v20, %v942_v17 }
  0x24   : > { %v1193_v24 = vmul.f32 %v998_v21, %v471_v18  ;;  %v1195_v25 = vmul.f32 %v998_v21, %v943_v19 }
  0x25   : > { %v478_v26 = vand.u32 2147483647, %v1189_v22  ;;  %v486_v27 = vand.u32 2147483647, %v1191_v23  ;;  %vm558_vm3 = vcmp.ge.f32.partialorder %v1189_v22, 0.0 }
  0x26   : > { %v479_v28 = vand.u32 2147483647, %v1193_v24  ;;  %v487_v29 = vand.u32 2147483647, %v1195_v25 }
  0x27   : > { %v480_v30 = vsub.f32 0.0, %v478_v26  ;;  %v488_v31 = vsub.f32 0.0, %v486_v27 }
  0x28   : > { %v481_v32 = vsub.f32 0.0, %v479_v28  ;;  %v489_v33 = vsub.f32 0.0, %v487_v29 }
  0x29   : > { %v482_v34 = vmul.f32 1.442695, %v480_v30  ;;  %v490_v35 = vmul.f32 1.442695, %v488_v31 }
  0x2a   : > { %v484_v36 = vmul.f32 1.442695, %v481_v32  ;;  %v492_v37 = vmul.f32 1.442695, %v489_v33 }
  0x2b   : > { %999 = vpow2.f32 %v482_v34 }
  0x2c   : > { %1001 = vpow2.f32 %v484_v36 }
  0x2d   : > { %1003 = vpow2.f32 %v490_v35 }
  0x2e   : > { %1005 = vpow2.f32 %v492_v37 }
  0x31   : > { %v1201_v38 = vpop.eup %999 }
  0x32   : > { %v1203_v39 = vpop.eup %1001  ;;  %v494_v40 = vadd.f32 1.0, %v1201_v38 }
  0x33   : > { %v1206_v41 = vpop.eup %1003  ;;  %v495_v42 = vadd.f32 1.0, %v1203_v39 }
  0x34   : > { %v1209_v43 = vpop.eup %1005  ;;  %v526_v44 = vadd.f32 1.0, %v1206_v41  ;;  %1007 = vrcp.f32 %v494_v40  ;;  %v507_v46 = vand.u32 2147483648, %v494_v40  ;;  %vm501_vm0 = vweird.f32 %v494_v40 }
  0x35   : > { %v527_v45 = vadd.f32 1.0, %v1209_v43  ;;  %1009 = vrcp.f32 %v495_v42  ;;  %v505_v48 = vand.u32 2147483647, %v494_v40  ;;  %vm516_vm2 = vweird.f32 %v495_v42 }
  0x36   : > { %1011 = vrcp.f32 %v526_v44  ;;  %vm533_vm1 = vweird.f32 %v526_v44  ;;  %v537_v51 = vand.u32 2147483647, %v526_v44  ;;  %v508_v53 = vor.u32 1.1754944e-38, %v507_v46 }
  0x37   : > { %1013 = vrcp.f32 %v527_v45  ;;  %v539_v54 = vand.u32 2147483648, %v526_v44  ;;  %v520_v56 = vand.u32 2147483647, %v495_v42  ;;  %v522_v60 = vand.u32 2147483648, %v495_v42 }
  0x38   : > { %vm548_vm6 = vweird.f32 %v527_v45  ;;  %v554_v2 = vand.u32 2147483648, %v527_v45  ;;  %v552_v7 = vand.u32 2147483647, %v527_v45  ;;  %vm506_vm10 = vcmp.eq.f32.partialorder %v505_v48, 8.507059e+37 }
  0x39   : > { %v523_v13 = vor.u32 1.1754944e-38, %v522_v60  ;;  %v540_v15 = vor.u32 1.1754944e-38, %v539_v54  ;;  %vm521_vm13 = vcmp.eq.f32.partialorder %v520_v56, 8.507059e+37  ;;  %vm538_vm14 = vcmp.eq.f32.partialorder %v537_v51, 8.507059e+37 }
  0x3a   : > { %v1008_v47 = vpop.eup %1007  ;;  %v555_v21 = vor.u32 1.1754944e-38, %v554_v2  ;;  %v579_v54 = vmin.f32 %v1193_v24, 0.0 }
  0x3b   : > { %v1010_v49 = vpop.eup %1009  ;;  %v497_v50 = vmul.f32 %v1008_v47, %v494_v40  ;;  %vm502_vm4 = vweird.f32 %v1008_v47 }
  0x3c   : > { %v1012_v52 = vpop.eup %1011  ;;  %v512_v55 = vmul.f32 %v1010_v49, %v495_v42  ;;  %vm517_vm5 = vweird.f32 %v1010_v49  ;;  %vm1215_vm8 = vmor %vm501_vm0, %vm502_vm4  ;;  %vm553_vm0 = vcmp.eq.f32.partialorder %v552_v7, 8.507059e+37  ;;  %vm565_vm4 = vcmp.ge.f32.partialorder %v1195_v25, 0.0 }
  0x3d   : > { %v1014_v57 = vpop.eup %1013  ;;  %v498_v58 = vsub.f32 1.0, %v497_v50  ;;  %v529_v59 = vmul.f32 %v1012_v52, %v526_v44  ;;  %vm534_vm7 = vweird.f32 %v1012_v52  ;;  %vm1221_vm11 = vmor %vm516_vm2, %vm517_vm5  ;;  %vm564_vm2 = vcmp.ge.f32.partialorder %v1191_v23, 0.0 }
  0x3e   : > { %v513_v61 = vsub.f32 1.0, %v512_v55  ;;  %v544_v62 = vmul.f32 %v1014_v57, %v527_v45  ;;  %vm549_vm9 = vweird.f32 %v1014_v57  ;;  %vm1226_vm12 = vmor %vm533_vm1, %vm534_vm7  ;;  %vm559_vm1 = vcmp.ge.f32.partialorder %v1193_v24, 0.0 }
  0x3f   : > { %v499_v63 = vmul.f32 %v1008_v47, %v498_v58  ;;  %v530_v1 = vsub.f32 1.0, %v529_v59  ;;  %vm1234_vm15 = vmor %vm548_vm6, %vm549_vm9  ;;  %vm574_vm5 = vcmp.lt.f32.partialorder %v1180_v5, -0.999  ;;  %vm576_vm6 = vcmp.gt.f32.partialorder %v1180_v5, 0.999 }
  0x40   : > { %v514_v4 = vmul.f32 %v1010_v49, %v513_v61  ;;  %v545_v6 = vsub.f32 1.0, %v544_v62  ;;  %vm575_vm7 = vcmp.lt.f32.partialorder %v1184_v10, -0.999 }
  0x41   : > { %v500_v8 = vadd.f32 %v1008_v47, %v499_v63  ;;  %v531_v11 = vmul.f32 %v1012_v52, %v530_v1 }
  0x42   : > { %v515_v16 = vadd.f32 %v1010_v49, %v514_v4  ;;  %v546_v17 = vmul.f32 %v1014_v57, %v545_v6 }
  0x43   : > { %v504_v18 = vsel %vm1215_vm8, %v1008_v47, %v500_v8  ;;  %v532_v19 = vadd.f32 %v1012_v52, %v531_v11 }
  0x44   : > { %v509_v26 = vsel %vm506_vm10, %v508_v53, %v504_v18  ;;  %v519_v27 = vsel %vm1221_vm11, %v1010_v49, %v515_v16  ;;  %v547_v28 = vadd.f32 %v1014_v57, %v546_v17 }
  0x45   : > { %v536_v29 = vsel %vm1226_vm12, %v1012_v52, %v532_v19  ;;  %v560_v30 = vmul.f32 %v1201_v38, %v509_v26  ;;  %v524_v31 = vsel %vm521_vm13, %v523_v13, %v519_v27 }
  0x46   : > { %v541_v32 = vsel %vm538_vm14, %v540_v15, %v536_v29  ;;  %v551_v33 = vsel %vm1234_vm15, %v1014_v57, %v547_v28  ;;  %v561_v34 = vmul.f32 %v1203_v39, %v524_v31  ;;  %v580_v39 = vmax.f32 %v1191_v23, 0.0 }
  0x47   : > { %v562_v35 = vsel %vm558_vm3, %v509_v26, %v560_v30  ;;  %v566_v36 = vmul.f32 %v1206_v41, %v541_v32  ;;  %v556_v37 = vsel %vm553_vm0, %v555_v21, %v551_v33  ;;  %vm577_vm3 = vcmp.gt.f32.partialorder %v1184_v10, 0.999 }
  0x48   : > { %v563_v38 = vsel %vm559_vm1, %v524_v31, %v561_v34  ;;  %v567_v40 = vmul.f32 %v1209_v43, %v556_v37  ;;  %v581_v41 = vmax.f32 %v1195_v25, 0.0  ;;  %v582_v49 = vsub.f32 0.0, %v580_v39 }
  0x49   : > { %v568_v42 = vsel %vm564_vm2, %v541_v32, %v566_v36  ;;  %v578_v25 = vmin.f32 %v1189_v22, 0.0 }
  0x4a   : > { %v570_v44 = vsub.f32 %v562_v35, %v568_v42  ;;  %v569_v45 = vsel %vm565_vm4, %v556_v37, %v567_v40  ;;  %v583_v52 = vsub.f32 0.0, %v581_v41  ;;  %v584_v53 = vsel %vm576_vm6, %v582_v49, 0.0 }
  0x4b   : > { %v571_v46 = vsub.f32 %v563_v38, %v569_v45  ;;  %v586_v57 = vsel %vm574_vm5, %v578_v25, %v584_v53 }
  0x4c   : > { %v572_v47 = vmax.f32 %v570_v44, 1e-12  ;;  %v585_v55 = vsel %vm577_vm3, %v583_v52, 0.0 }
  0x4d   : > { %v573_v48 = vmax.f32 %v571_v46, 1e-12  ;;  %v587_v60 = vsel %vm575_vm7, %v579_v54, %v585_v55 }
  0x4e   : > { %v588_v43 = vsel %vm576_vm6, %v541_v32, %v572_v47 }
  0x4f   : > { %v590_v50 = vsel %vm574_vm5, %v509_v26, %v588_v43  ;;  %v589_v51 = vsel %vm577_vm3, %v556_v37, %v573_v48 }
  0x50   : > { %1015 = vlog2.f32 %v590_v50  ;;  %v591_v23 = vsel %vm575_vm7, %v524_v31, %v589_v51 }
  0x51   : > { %1017 = vlog2.f32 %v591_v23 }
  0x56   : > { %v1016_v56 = vpop.eup %1015 }
  0x57   : > { %v1018_v58 = vpop.eup %1017  ;;  %v593_v59 = vmul.f32 0.6931472, %v1016_v56 }
  0x58   : > { %v595_v61 = vmul.f32 0.6931472, %v1018_v58 }
  0x59   : > { %v596_v62 = vadd.f32 %v593_v59, %v586_v57 }
  0x5a   : > { %v597_v63 = vadd.f32 %v595_v61, %v587_v60  ;;  %612 = sbr.rel (%p947_p7) target bundleno = 148 (0x94), region = 40 }
  0x5b   : > { %v603_v22 = vadd.f32 %v596_v62, %v1169_v0 }
  0x5c   : > { %v604_v1 = vadd.f32 %v597_v63, %v1182_v9 }
  0x5d   : > { %607 = vst [vmem:[%s606_s24] sm:$0xff] %v603_v22 }
  0x5e   : > { %608 = vst [vmem:[%s606_s24 + $0x8] sm:$0xff] %v604_v1 }
  0x5f   : > { %v613_v5 = vld [vmem:[#allocation2] sm:$0xff]  ;;  %v616_v24 = vld [vmem:[#allocation2 + $0x10] sm:$0xff]  ;;  %v614_v11 = vld [vmem:[#allocation2 + $0x8] sm:$0xff] }
  0x60   : > { %v621_v2 = vld [vmem:[#allocation2 + $0x20] sm:$0xff]  ;;  %v618_v3 = vmax.f32 %v613_v5, %v616_v24  ;;  %v626_v6 = vld [vmem:[#allocation2 + $0x30] sm:$0xff]  ;;  %v617_v9 = vld [vmem:[#allocation2 + $0x18] sm:$0xff] }
  0x61   : > { %v622_v13 = vld [vmem:[#allocation2 + $0x28] sm:$0xff]  ;;  %v619_v15 = vmax.f32 %v614_v11, %v617_v9  ;;  %v627_v21 = vld [vmem:[#allocation2 + $0x38] sm:$0xff] }
  0x62   : > { %v623_v0 = vmax.f32 %v618_v3, %v621_v2 }
  0x63   : > { %v624_v20 = vmax.f32 %v619_v15, %v622_v13 }
  0x64   : > { %v1278_v18 = vmax.f32 %v623_v0, %v626_v6 }
  0x65   : > { %v666_v10 = vld [vmem:[#allocation3] sm:$0xff]  ;;  %v669_v4 = vld [vmem:[#allocation3 + $0x10] sm:$0xff]  ;;  %v667_v16 = vld [vmem:[#allocation3 + $0x8] sm:$0xff]  ;;  %v1289_v38 = vmax.f32 %v624_v20, %v627_v21 }
  0x66   : > { %v671_v7 = vmax.f32 %v666_v10, %v669_v4  ;;  %v674_v8 = vld [vmem:[#allocation3 + $0x20] sm:$0xff]  ;;  %v679_v12 = vld [vmem:[#allocation3 + $0x30] sm:$0xff]  ;;  %v670_v17 = vld [vmem:[#allocation3 + $0x18] sm:$0xff]  ;;  %v630_v27 = vsub.f32 %v613_v5, %v1278_v18  ;;  %v636_v28 = vsub.f32 %v616_v24, %v1278_v18  ;;  %v644_v29 = vsub.f32 %v621_v2, %v1278_v18 }
  0x67   : > { %v672_v26 = vmax.f32 %v667_v16, %v670_v17  ;;  %v652_v30 = vsub.f32 %v626_v6, %v1278_v18  ;;  %v675_v31 = vld [vmem:[#allocation3 + $0x28] sm:$0xff]  ;;  %v680_v45 = vld [vmem:[#allocation3 + $0x38] sm:$0xff]  ;;  %v631_v46 = vsub.f32 %v614_v11, %v1289_v38  ;;  %v637_v41 = vsub.f32 %v617_v9, %v1289_v38 }
  0x68   : > { %v676_v14 = vmax.f32 %v671_v7, %v674_v8  ;;  %v632_v35 = vmul.f32 1.442695, %v630_v27  ;;  %v638_v36 = vmul.f32 1.442695, %v636_v28  ;;  %v646_v37 = vmul.f32 1.442695, %v644_v29 }
  0x69   : > { %v654_v40 = vmul.f32 1.442695, %v652_v30  ;;  %v677_v44 = vmax.f32 %v672_v26, %v675_v31  ;;  %v645_v43 = vsub.f32 %v622_v13, %v1289_v38  ;;  %v653_v51 = vsub.f32 %v627_v21, %v1289_v38 }
  0x6a   : > { %v1280_v19 = vmax.f32 %v676_v14, %v679_v12  ;;  %1019 = vpow2.f32 %v632_v35  ;;  %v634_v52 = vmul.f32 1.442695, %v631_v46  ;;  %v640_v25 = vmul.f32 1.442695, %v637_v41 }
  0x6b   : > { %1021 = vpow2.f32 %v638_v36  ;;  %v1295_v49 = vmax.f32 %v677_v44, %v680_v45  ;;  %v648_v55 = vmul.f32 1.442695, %v645_v43  ;;  %v656_v57 = vmul.f32 1.442695, %v653_v51 }
  0x6c   : > { %v683_v32 = vsub.f32 %v666_v10, %v1280_v19  ;;  %v689_v33 = vsub.f32 %v669_v4, %v1280_v19  ;;  %v697_v34 = vsub.f32 %v674_v8, %v1280_v19  ;;  %v705_v42 = vsub.f32 %v679_v12, %v1280_v19 }
  0x6d   : > { %1023 = vpow2.f32 %v646_v37  ;;  %v684_v23 = vsub.f32 %v667_v16, %v1295_v49  ;;  %v690_v53 = vsub.f32 %v670_v17, %v1295_v49  ;;  %v698_v58 = vsub.f32 %v675_v31, %v1295_v49 }
  0x6e   : > { %v685_v39 = vmul.f32 1.442695, %v683_v32  ;;  %v691_v47 = vmul.f32 1.442695, %v689_v33  ;;  %v699_v48 = vmul.f32 1.442695, %v697_v34  ;;  %1025 = vpow2.f32 %v654_v40 }
  0x6f   : > { %v707_v50 = vmul.f32 1.442695, %v705_v42  ;;  %v687_v61 = vmul.f32 1.442695, %v684_v23  ;;  %v706_v62 = vsub.f32 %v680_v45, %v1295_v49  ;;  %v693_v22 = vmul.f32 1.442695, %v690_v53 }
  0x70   : > { %1027 = vpow2.f32 %v685_v39  ;;  %v1020_v54 = vpop.eup %1019  ;;  %v701_v2 = vmul.f32 1.442695, %v698_v58 }
  0x71   : > { %1029 = vpow2.f32 %v691_v47  ;;  %v1022_v56 = vpop.eup %1021  ;;  %v709_v6 = vmul.f32 1.442695, %v706_v62 }
  0x72   : > { %1031 = vpow2.f32 %v699_v48  ;;  %v642_v60 = vadd.f32 %v1022_v56, %v1020_v54 }
  0x73   : > { %1033 = vpow2.f32 %v707_v50  ;;  %v1024_v59 = vpop.eup %1023 }
  0x74   : > { %1035 = vpow2.f32 %v634_v52  ;;  %v1026_v63 = vpop.eup %1025  ;;  %v650_v5 = vadd.f32 %v1024_v59, %v642_v60 }
  0x75   : > { %1037 = vpow2.f32 %v640_v25 }
  0x76   : > { %v1028_v1 = vpop.eup %1027  ;;  %1039 = vpow2.f32 %v648_v55  ;;  %v658_v10 = vadd.f32 %v1026_v63, %v650_v5 }
  0x77   : > { %v1030_v24 = vpop.eup %1029  ;;  %1041 = vpow2.f32 %v656_v57 }
  0x78   : > { %v1032_v3 = vpop.eup %1031  ;;  %v695_v4 = vadd.f32 %v1030_v24, %v1028_v1  ;;  %1043 = vpow2.f32 %v687_v61 }
  0x79   : > { %v1034_v7 = vpop.eup %1033  ;;  %1045 = vpow2.f32 %v693_v22 }
  0x7a   : > { %v1036_v8 = vpop.eup %1035  ;;  %1047 = vlog2.f32 %v658_v10  ;;  %v703_v11 = vadd.f32 %v1032_v3, %v695_v4 }
  0x7b   : > { %v1038_v0 = vpop.eup %1037  ;;  %1049 = vpow2.f32 %v701_v2 }
  0x7c   : > { %v1040_v12 = vpop.eup %1039  ;;  %v711_v9 = vadd.f32 %v1034_v7, %v703_v11  ;;  %v643_v13 = vadd.f32 %v1038_v0, %v1036_v8  ;;  %1051 = vpow2.f32 %v709_v6 }
  0x7d   : > { %v1042_v14 = vpop.eup %1041 }
  0x7e   : > { %v1044_v15 = vpop.eup %1043  ;;  %1053 = vlog2.f32 %v711_v9  ;;  %v651_v16 = vadd.f32 %v1040_v12, %v643_v13 }
  0x7f   : > { %v1046_v17 = vpop.eup %1045 }
  0x80   : > { %v1048_v20 = vpop.eup %1047  ;;  %v659_v21 = vadd.f32 %v1042_v14, %v651_v16  ;;  %v696_v26 = vadd.f32 %v1046_v17, %v1044_v15 }
  0x81   : > { %v1050_v27 = vpop.eup %1049  ;;  %v661_v28 = vmul.f32 0.6931472, %v1048_v20 }
  0x82   : > { %v1052_v29 = vpop.eup %1051  ;;  %1055 = vlog2.f32 %v659_v21  ;;  %v704_v30 = vadd.f32 %v1050_v27, %v696_v26 }
  0x83   : > { %v664_v33 = vadd.f32 %v661_v28, %v1278_v18 }
  0x84   : > { %v1054_v31 = vpop.eup %1053  ;;  %v712_v32 = vadd.f32 %v1052_v29, %v704_v30 }
  0x85   : > { %v714_v34 = vmul.f32 0.6931472, %v1054_v31 }
  0x86   : > { %1057 = vlog2.f32 %v712_v32 }
  0x87   : > { %v717_v35 = vadd.f32 %v714_v34, %v1280_v19 }
  0x88   : > { %v1056_v36 = vpop.eup %1055 }
  0x89   : > { %v719_v37 = vsub.f32 %v664_v33, %v717_v35  ;;  %v663_v40 = vmul.f32 0.6931472, %v1056_v36 }
  0x8b   : > { %721 = vst [vmem:[%s1161_s28] sm:$0xff] %v719_v37  ;;  %v665_v44 = vadd.f32 %v663_v40, %v1289_v38 }
  0x8c   : > { %v1058_v42 = vpop.eup %1057 }
  0x8d   : > { %v716_v45 = vmul.f32 0.6931472, %v1058_v42 }
  0x8f   : > { %v718_v39 = vadd.f32 %v716_v45, %v1295_v49 }
  0x91   : > { %v720_v46 = vsub.f32 %v665_v44, %v718_v39 }
  0x93   : > { %722 = vst [vmem:[%s1161_s28 + $0x8] sm:$0xff] %v720_v46 }
  0x94 PF: > { %s14_s19 = sadd.s32 1, %s1097_s19   ;;  %s1336_s15 = smov %s1089_s17 }
  0x95   : > { %p11_p8 = scmp.ge.s32.totalorder %s14_s19, 10   ;;  %s1337_s16 = smov %s1093_s18 }
  0x96   : > { %s1338_s17 = smov %s1341_s20  ;;  %s1339_s18 = smov %s1345_s21 }
  0x97   :  { %13 = sbr.rel (!%p11_p8) target bundleno = 3 (0x3), region = 87 }

</bundles_post_ra>
